<compile_context>
chip_gen: v6e
topology: v6e:2x2x1
jax: 0.10.0
libtpu: 0.0.40
codegen_flags: <defaults>
</compile_context>

<pallas_src>
import functools
import math

import jax
import jax.numpy as jnp
from jax import lax
from jax.experimental import pallas as pl
from jax.experimental.pallas import tpu as pltpu


# ----------------------------------------------------------------------------
# Pallas kernel: fused embedding gather + score + masked partial loss per tile
# ----------------------------------------------------------------------------
def _analogy_loss_kernel(h_ids, r_ids, t_ids,            # scalar prefetch (SMEM)
                         ent_ref, rel_ref,                # fused tables (HBM, pl.ANY)
                         y_ref,                           # labels block (VMEM)
                         out_ref,                         # (1,1,1) partial loss
                         hbuf, tbuf, rbuf, sem,           # scratch
                         *, tile_b, half, batch_b):
    base = pl.program_id(0) * tile_b

    # ---- fused embedding gather: one row DMA per (h, t, r) per batch row ------
    @pl.loop(0, tile_b)
    def _issue(j):
        pltpu.make_async_copy(ent_ref.at[h_ids[base + j]], hbuf.at[j], sem.at[0]).start()
        pltpu.make_async_copy(ent_ref.at[t_ids[base + j]], tbuf.at[j], sem.at[1]).start()
        pltpu.make_async_copy(rel_ref.at[r_ids[base + j]], rbuf.at[j], sem.at[2]).start()

    @pl.loop(0, tile_b)
    def _wait(j):
        pltpu.make_async_copy(ent_ref.at[0], hbuf.at[j], sem.at[0]).wait()
        pltpu.make_async_copy(ent_ref.at[0], tbuf.at[j], sem.at[1]).wait()
        pltpu.make_async_copy(rel_ref.at[0], rbuf.at[j], sem.at[2]).wait()

    # ---- lane-aligned ref slices (half is a multiple of 128) ------------------
    h_re, h_im, h_p = hbuf[:, :half], hbuf[:, half:2 * half], hbuf[:, 2 * half:]
    t_re, t_im, t_p = tbuf[:, :half], tbuf[:, half:2 * half], tbuf[:, 2 * half:]
    r_re, r_im, r_p = rbuf[:, :half], rbuf[:, half:2 * half], rbuf[:, 2 * half:]

    # Factored complex trilinear form + real part (padded columns are zero).
    prod = (h_re * (r_re * t_re + r_im * t_im)
            + h_im * (r_re * t_im - r_im * t_re)
            + h_p * t_p * r_p)
    score = jnp.sum(prod, axis=-1, keepdims=True)                   # [tile_b, 1]

    # -log(sigmoid(score * y)) == softplus(-x), numerically stable.
    x = score * y_ref[...]
    nls = jnp.maximum(-x, 0.0) + jnp.log(1.0 + jnp.exp(-jnp.abs(x)))

    # In-kernel padding mask: rows >= batch_b are padding.
    rows = base + lax.broadcasted_iota(jnp.int32, (tile_b, 1), 0)
    valid = (rows < batch_b).astype(jnp.float32)

    out_ref[...] = jnp.sum(nls * valid, axis=0, keepdims=True)[None]   # (1,1,1)


# ----------------------------------------------------------------------------
# One-time (outside jit) fused, lane-aligned table construction
# ----------------------------------------------------------------------------
def prepare_analogy_tables(params):
    half = params["ent_re"].shape[1]
    half_pad = ((half + 127) // 128) * 128
    cpad = ((0, 0), (0, half_pad - half))
    ent_all = jnp.concatenate([jnp.pad(params["ent_re"], cpad),
                               jnp.pad(params["ent_im"], cpad),
                               jnp.pad(params["ent"], cpad)], axis=1)
    rel_all = jnp.concatenate([jnp.pad(params["rel_re"], cpad),
                               jnp.pad(params["rel_im"], cpad),
                               jnp.pad(params["rel"], cpad)], axis=1)
    return ent_all.astype(jnp.float32), rel_all.astype(jnp.float32)


# ----------------------------------------------------------------------------
# Wrapper: tiling decisions + pallas_call + tiny final sum
# ----------------------------------------------------------------------------
def analogy_forward_pallas(ent_all, rel_all, batch_h, batch_r, batch_t, batch_y):
    """Replicates Analogy.forward (scalar loss) from the fused tables."""
    _, W = ent_all.shape
    half_pad = W // 3
    B = batch_h.shape[0]

    # --- batch tile: as large as a ~24 MiB VMEM scratch budget allows ----------
    bytes_per_row = 3 * W * 4                       # three gathered f32 rows
    budget = 24 << 20
    rows_fit = max(8, budget // bytes_per_row)
    b_round8 = ((B + 7) // 8) * 8
    tile_b = int(min(1024, rows_fit, b_round8))
    tile_b = max(8, (tile_b // 8) * 8)
    num_tiles = -(-B // tile_b)
    if num_tiles < 2:                               # keep both v7x cores busy
        tile_b = max(8, ((tile_b // 2 + 7) // 8) * 8)
        num_tiles = max(2, -(-B // tile_b))
    b_pad = num_tiles * tile_b
    pad = b_pad - B

    # Padded ids gather valid row 0; padded rows are masked inside the kernel.
    bh = jnp.pad(batch_h.astype(jnp.int32), (0, pad))
    br = jnp.pad(batch_r.astype(jnp.int32), (0, pad))
    bt = jnp.pad(batch_t.astype(jnp.int32), (0, pad))
    y2d = jnp.pad(batch_y.astype(jnp.float32), (0, pad)).reshape(b_pad, 1)

    # VMEM: 3 gather buffers + double-buffered (tile_b,1) label blocks (each
    # lane-padded to tile_b*512 B) + output blocks + headroom; capped for v7x.
    vmem_need = 3 * tile_b * W * 4 + 2 * tile_b * 512 + 2 * 8 * 128 * 4
    vmem_limit = int(min(48 << 20, max(16 << 20, vmem_need + (8 << 20))))

    grid_spec = pltpu.PrefetchScalarGridSpec(
        num_scalar_prefetch=3,
        grid=(num_tiles,),
        in_specs=[
            pl.BlockSpec(memory_space=pl.ANY),                   # ent_all (HBM)
            pl.BlockSpec(memory_space=pl.ANY),                   # rel_all (HBM)
            pl.BlockSpec((tile_b, 1), lambda i, *_: (i, 0)),     # labels
        ],
        out_specs=pl.BlockSpec((1, 1, 1), lambda i, *_: (i, 0, 0)),
        scratch_shapes=[
            pltpu.VMEM((tile_b, W), jnp.float32),                # gathered h rows
            pltpu.VMEM((tile_b, W), jnp.float32),                # gathered t rows
            pltpu.VMEM((tile_b, W), jnp.float32),                # gathered r rows
            pltpu.SemaphoreType.DMA((3,)),
        ],
    )

    partials = pl.pallas_call(
        functools.partial(_analogy_loss_kernel,
                          tile_b=tile_b, half=half_pad, batch_b=B),
        out_shape=jax.ShapeDtypeStruct((num_tiles, 1, 1), jnp.float32),
        grid_spec=grid_spec,
        compiler_params=pltpu.CompilerParams(
            dimension_semantics=("parallel",),
            vmem_limit_bytes=vmem_limit,
        ),
    )(bh, br, bt, ent_all, rel_all, y2d)

    return jnp.sum(partials)


# ----------------------------------------------------------------------------
# Deterministic parameter construction (xavier_uniform_, like nn.init)
# ----------------------------------------------------------------------------
def _xavier_uniform(key, shape):
    bound = math.sqrt(6.0 / (shape[0] + shape[1]))
    return jax.random.uniform(key, shape, jnp.float32, minval=-bound, maxval=bound)


def init_analogy_params(key, num_ents, num_rels, hidden_size):
    half = int(hidden_size / 2.0)
    keys = jax.random.split(key, 6)
    return {
        "ent_re": _xavier_uniform(keys[0], (num_ents, half)),
        "ent_im": _xavier_uniform(keys[1], (num_ents, half)),
        "rel_re": _xavier_uniform(keys[2], (num_rels, half)),
        "rel_im": _xavier_uniform(keys[3], (num_rels, half)),
        "ent":    _xavier_uniform(keys[4], (num_ents, half)),
        "rel":    _xavier_uniform(keys[5], (num_rels, half)),
    }


# ----------------------------------------------------------------------------
# Pure-JAX reference (literal translation of the PyTorch forward)
# ----------------------------------------------------------------------------
def analogy_forward_ref(params, batch_h, batch_r, batch_t, batch_y):
    h_re = params["ent_re"][batch_h]
    h_im = params["ent_im"][batch_h]
    h = params["ent"][batch_h]
    t_re = params["ent_re"][batch_t]
    t_im = params["ent_im"][batch_t]
    t = params["ent"][batch_t]
    r_re = params["rel_re"][batch_r]
    r_im = params["rel_im"][batch_r]
    r = params["rel"][batch_r]
    score = (jnp.sum(r_re * h_re * t_re + r_re * h_im * t_im
                     + r_im * h_re * t_im - r_im * h_im * t_re, -1)
             + jnp.sum(h * t * r, -1))
    return jnp.sum(-jnp.log(jax.nn.sigmoid(score * batch_y.astype(jnp.float32))))


if __name__ == "__main__":
    num_ents = 64
    num_rels = 16
    hidden_size = 32   # -> half-hidden = 16 (padded to 128 lanes in the fused tables)
    batch = 8

    key = jax.random.PRNGKey(0)
    k_param, k_h, k_r, k_t, k_y = jax.random.split(key, 5)

    params = init_analogy_params(k_param, num_ents, num_rels, hidden_size)
    # Built once, outside jit (no per-forward table concatenation / HBM rewrite).
    ent_all, rel_all = prepare_analogy_tables(params)

    batch_h = jax.random.randint(k_h, (batch,), 0, num_ents, dtype=jnp.int32)
    batch_r = jax.random.randint(k_r, (batch,), 0, num_rels, dtype=jnp.int32)
    batch_t = jax.random.randint(k_t, (batch,), 0, num_ents, dtype=jnp.int32)
    batch_y = jax.random.bernoulli(k_y, 0.5, (batch,)).astype(jnp.float32) * 2.0 - 1.0

    fwd = jax.jit(analogy_forward_pallas)
    loss = jax.block_until_ready(fwd(ent_all, rel_all, batch_h, batch_r, batch_t, batch_y))

    ref = analogy_forward_ref(params, batch_h, batch_r, batch_t, batch_y)
    assert jnp.allclose(loss, ref, rtol=1e-5, atol=1e-4), (loss, ref)

    print("KERNEL_OK")
</pallas_src>

<mosaic_0001>
module attributes {stable_mosaic.version = 11 : i64} {
  func.func @_analogy_loss_kernel(%arg0: i32, %arg1: memref<16xi32, #tpu.memory_space<smem>>, %arg2: memref<16xi32, #tpu.memory_space<smem>>, %arg3: memref<16xi32, #tpu.memory_space<smem>>, %arg4: memref<64x384xf32, #tpu.memory_space<any>>, %arg5: memref<16x384xf32, #tpu.memory_space<any>>, %arg6: memref<8x1xf32, #tpu.memory_space<vmem>>, %arg7: memref<1x1x1xf32, #tpu.memory_space<vmem>>, %arg8: memref<8x384xf32, #tpu.memory_space<vmem>>, %arg9: memref<8x384xf32, #tpu.memory_space<vmem>>, %arg10: memref<8x384xf32, #tpu.memory_space<vmem>>, %arg11: memref<3x!tpu.dma_semaphore, #tpu.memory_space<semaphore_mem>>) attributes {dimension_semantics = [#tpu.dimension_semantics<parallel>], iteration_bounds = array<i64: 2>, scalar_prefetch = 3 : i64, scratch_operands = 4 : i64, tpu.core_type = #tpu.core_type<tc>, window_params = [{}, {}, {transform_indices = @transform_2, window_bounds = array<i64: 8, 1>}, {transform_indices = @transform_3, window_bounds = array<i64: 1, 1, 1>}]} {
    %c8_i32 = arith.constant 8 : i32
    %0 = arith.muli %arg0, %c8_i32 : i32
    %c0_i32 = arith.constant 0 : i32
    %c8_i32_0 = arith.constant 8 : i32
    %1 = arith.addi %c0_i32, %c8_i32_0 : i32
    %c1_i32 = arith.constant 1 : i32
    scf.for %arg12 = %c0_i32 to %1 step %c1_i32  : i32 {
      %c1_i32_32 = arith.constant 1 : i32
      %52 = arith.muli %arg12, %c1_i32_32 : i32
      %c0_i32_33 = arith.constant 0 : i32
      %53 = arith.addi %c0_i32_33, %52 : i32
      %54 = arith.addi %0, %53 : i32
      %55 = arith.index_cast %54 : i32 to index
      %56 = memref.load %arg1[%55] : memref<16xi32, #tpu.memory_space<smem>>
      %c0_i32_34 = arith.constant 0 : i32
      %c0_i32_35 = arith.constant 0 : i32
      %57 = tpu.memref_slice %arg4[%56, %c0_i32_35] : memref<64x384xf32, #tpu.memory_space<any>> -> memref<1x384xf32, #tpu.memory_space<any>>
      %58 = tpu.memref_squeeze %57 : memref<1x384xf32, #tpu.memory_space<any>> -> memref<384xf32, #tpu.memory_space<any>>
      %c0_i32_36 = arith.constant 0 : i32
      %59 = tpu.memref_slice %arg8[%53, %c0_i32_36] : memref<8x384xf32, #tpu.memory_space<vmem>> -> memref<1x384xf32, #tpu.memory_space<vmem>>
      %60 = tpu.memref_squeeze %59 : memref<1x384xf32, #tpu.memory_space<vmem>> -> memref<384xf32, #tpu.memory_space<vmem>>
      %61 = tpu.memref_slice %arg11[%c0_i32_34] : memref<3x!tpu.dma_semaphore, #tpu.memory_space<semaphore_mem>> -> memref<1x!tpu.dma_semaphore, #tpu.memory_space<semaphore_mem>>
      %62 = tpu.memref_squeeze %61 : memref<1x!tpu.dma_semaphore, #tpu.memory_space<semaphore_mem>> -> memref<!tpu.dma_semaphore, #tpu.memory_space<semaphore_mem>>
      tpu.enqueue_dma source(%58 : memref<384xf32, #tpu.memory_space<any>>) target(%60 : memref<384xf32, #tpu.memory_space<vmem>>) target_semaphore(%62 : memref<!tpu.dma_semaphore, #tpu.memory_space<semaphore_mem>>)
      %63 = arith.addi %0, %53 : i32
      %64 = arith.index_cast %63 : i32 to index
      %65 = memref.load %arg3[%64] : memref<16xi32, #tpu.memory_space<smem>>
      %c1_i32_37 = arith.constant 1 : i32
      %c0_i32_38 = arith.constant 0 : i32
      %66 = tpu.memref_slice %arg4[%65, %c0_i32_38] : memref<64x384xf32, #tpu.memory_space<any>> -> memref<1x384xf32, #tpu.memory_space<any>>
      %67 = tpu.memref_squeeze %66 : memref<1x384xf32, #tpu.memory_space<any>> -> memref<384xf32, #tpu.memory_space<any>>
      %c0_i32_39 = arith.constant 0 : i32
      %68 = tpu.memref_slice %arg9[%53, %c0_i32_39] : memref<8x384xf32, #tpu.memory_space<vmem>> -> memref<1x384xf32, #tpu.memory_space<vmem>>
      %69 = tpu.memref_squeeze %68 : memref<1x384xf32, #tpu.memory_space<vmem>> -> memref<384xf32, #tpu.memory_space<vmem>>
      %70 = tpu.memref_slice %arg11[%c1_i32_37] : memref<3x!tpu.dma_semaphore, #tpu.memory_space<semaphore_mem>> -> memref<1x!tpu.dma_semaphore, #tpu.memory_space<semaphore_mem>>
      %71 = tpu.memref_squeeze %70 : memref<1x!tpu.dma_semaphore, #tpu.memory_space<semaphore_mem>> -> memref<!tpu.dma_semaphore, #tpu.memory_space<semaphore_mem>>
      tpu.enqueue_dma source(%67 : memref<384xf32, #tpu.memory_space<any>>) target(%69 : memref<384xf32, #tpu.memory_space<vmem>>) target_semaphore(%71 : memref<!tpu.dma_semaphore, #tpu.memory_space<semaphore_mem>>)
      %72 = arith.addi %0, %53 : i32
      %73 = arith.index_cast %72 : i32 to index
      %74 = memref.load %arg2[%73] : memref<16xi32, #tpu.memory_space<smem>>
      %c2_i32 = arith.constant 2 : i32
      %c0_i32_40 = arith.constant 0 : i32
      %75 = tpu.memref_slice %arg5[%74, %c0_i32_40] : memref<16x384xf32, #tpu.memory_space<any>> -> memref<1x384xf32, #tpu.memory_space<any>>
      %76 = tpu.memref_squeeze %75 : memref<1x384xf32, #tpu.memory_space<any>> -> memref<384xf32, #tpu.memory_space<any>>
      %c0_i32_41 = arith.constant 0 : i32
      %77 = tpu.memref_slice %arg10[%53, %c0_i32_41] : memref<8x384xf32, #tpu.memory_space<vmem>> -> memref<1x384xf32, #tpu.memory_space<vmem>>
      %78 = tpu.memref_squeeze %77 : memref<1x384xf32, #tpu.memory_space<vmem>> -> memref<384xf32, #tpu.memory_space<vmem>>
      %79 = tpu.memref_slice %arg11[%c2_i32] : memref<3x!tpu.dma_semaphore, #tpu.memory_space<semaphore_mem>> -> memref<1x!tpu.dma_semaphore, #tpu.memory_space<semaphore_mem>>
      %80 = tpu.memref_squeeze %79 : memref<1x!tpu.dma_semaphore, #tpu.memory_space<semaphore_mem>> -> memref<!tpu.dma_semaphore, #tpu.memory_space<semaphore_mem>>
      tpu.enqueue_dma source(%76 : memref<384xf32, #tpu.memory_space<any>>) target(%78 : memref<384xf32, #tpu.memory_space<vmem>>) target_semaphore(%80 : memref<!tpu.dma_semaphore, #tpu.memory_space<semaphore_mem>>)
    }
    %c8_i32_1 = arith.constant 8 : i32
    %c0_i32_2 = arith.constant 0 : i32
    %c8_i32_3 = arith.constant 8 : i32
    %2 = arith.addi %c0_i32_2, %c8_i32_3 : i32
    %c1_i32_4 = arith.constant 1 : i32
    scf.for %arg12 = %c0_i32_2 to %2 step %c1_i32_4  : i32 {
      %c1_i32_32 = arith.constant 1 : i32
      %52 = arith.muli %arg12, %c1_i32_32 : i32
      %c0_i32_33 = arith.constant 0 : i32
      %53 = arith.addi %c0_i32_33, %52 : i32
      %c0_i32_34 = arith.constant 0 : i32
      %c0_i32_35 = arith.constant 0 : i32
      %c0_i32_36 = arith.constant 0 : i32
      %54 = tpu.memref_slice %arg4[%c0_i32_34, %c0_i32_36] : memref<64x384xf32, #tpu.memory_space<any>> -> memref<1x384xf32, #tpu.memory_space<any>>
      %55 = tpu.memref_squeeze %54 : memref<1x384xf32, #tpu.memory_space<any>> -> memref<384xf32, #tpu.memory_space<any>>
      %c0_i32_37 = arith.constant 0 : i32
      %56 = tpu.memref_slice %arg8[%53, %c0_i32_37] : memref<8x384xf32, #tpu.memory_space<vmem>> -> memref<1x384xf32, #tpu.memory_space<vmem>>
      %57 = tpu.memref_squeeze %56 : memref<1x384xf32, #tpu.memory_space<vmem>> -> memref<384xf32, #tpu.memory_space<vmem>>
      %58 = tpu.memref_slice %arg11[%c0_i32_35] : memref<3x!tpu.dma_semaphore, #tpu.memory_space<semaphore_mem>> -> memref<1x!tpu.dma_semaphore, #tpu.memory_space<semaphore_mem>>
      %59 = tpu.memref_squeeze %58 : memref<1x!tpu.dma_semaphore, #tpu.memory_space<semaphore_mem>> -> memref<!tpu.dma_semaphore, #tpu.memory_space<semaphore_mem>>
      tpu.wait_dma2 semaphore(%59 : memref<!tpu.dma_semaphore, #tpu.memory_space<semaphore_mem>>) src(%55 : memref<384xf32, #tpu.memory_space<any>>) dst(%57 : memref<384xf32, #tpu.memory_space<vmem>>)
      %c0_i32_38 = arith.constant 0 : i32
      %c1_i32_39 = arith.constant 1 : i32
      %c0_i32_40 = arith.constant 0 : i32
      %60 = tpu.memref_slice %arg4[%c0_i32_38, %c0_i32_40] : memref<64x384xf32, #tpu.memory_space<any>> -> memref<1x384xf32, #tpu.memory_space<any>>
      %61 = tpu.memref_squeeze %60 : memref<1x384xf32, #tpu.memory_space<any>> -> memref<384xf32, #tpu.memory_space<any>>
      %c0_i32_41 = arith.constant 0 : i32
      %62 = tpu.memref_slice %arg9[%53, %c0_i32_41] : memref<8x384xf32, #tpu.memory_space<vmem>> -> memref<1x384xf32, #tpu.memory_space<vmem>>
      %63 = tpu.memref_squeeze %62 : memref<1x384xf32, #tpu.memory_space<vmem>> -> memref<384xf32, #tpu.memory_space<vmem>>
      %64 = tpu.memref_slice %arg11[%c1_i32_39] : memref<3x!tpu.dma_semaphore, #tpu.memory_space<semaphore_mem>> -> memref<1x!tpu.dma_semaphore, #tpu.memory_space<semaphore_mem>>
      %65 = tpu.memref_squeeze %64 : memref<1x!tpu.dma_semaphore, #tpu.memory_space<semaphore_mem>> -> memref<!tpu.dma_semaphore, #tpu.memory_space<semaphore_mem>>
      tpu.wait_dma2 semaphore(%65 : memref<!tpu.dma_semaphore, #tpu.memory_space<semaphore_mem>>) src(%61 : memref<384xf32, #tpu.memory_space<any>>) dst(%63 : memref<384xf32, #tpu.memory_space<vmem>>)
      %c0_i32_42 = arith.constant 0 : i32
      %c2_i32 = arith.constant 2 : i32
      %c0_i32_43 = arith.constant 0 : i32
      %66 = tpu.memref_slice %arg5[%c0_i32_42, %c0_i32_43] : memref<16x384xf32, #tpu.memory_space<any>> -> memref<1x384xf32, #tpu.memory_space<any>>
      %67 = tpu.memref_squeeze %66 : memref<1x384xf32, #tpu.memory_space<any>> -> memref<384xf32, #tpu.memory_space<any>>
      %c0_i32_44 = arith.constant 0 : i32
      %68 = tpu.memref_slice %arg10[%53, %c0_i32_44] : memref<8x384xf32, #tpu.memory_space<vmem>> -> memref<1x384xf32, #tpu.memory_space<vmem>>
      %69 = tpu.memref_squeeze %68 : memref<1x384xf32, #tpu.memory_space<vmem>> -> memref<384xf32, #tpu.memory_space<vmem>>
      %70 = tpu.memref_slice %arg11[%c2_i32] : memref<3x!tpu.dma_semaphore, #tpu.memory_space<semaphore_mem>> -> memref<1x!tpu.dma_semaphore, #tpu.memory_space<semaphore_mem>>
      %71 = tpu.memref_squeeze %70 : memref<1x!tpu.dma_semaphore, #tpu.memory_space<semaphore_mem>> -> memref<!tpu.dma_semaphore, #tpu.memory_space<semaphore_mem>>
      tpu.wait_dma2 semaphore(%71 : memref<!tpu.dma_semaphore, #tpu.memory_space<semaphore_mem>>) src(%67 : memref<384xf32, #tpu.memory_space<any>>) dst(%69 : memref<384xf32, #tpu.memory_space<vmem>>)
    }
    %c8_i32_5 = arith.constant 8 : i32
    %c0 = arith.constant 0 : index
    %c0_6 = arith.constant 0 : index
    %3 = vector.load %arg8[%c0, %c0_6] : memref<8x384xf32, #tpu.memory_space<vmem>>, vector<8x128xf32>
    %c0_7 = arith.constant 0 : index
    %c128 = arith.constant 128 : index
    %4 = vector.load %arg8[%c0_7, %c128] : memref<8x384xf32, #tpu.memory_space<vmem>>, vector<8x128xf32>
    %c0_8 = arith.constant 0 : index
    %c256 = arith.constant 256 : index
    %5 = vector.load %arg8[%c0_8, %c256] : memref<8x384xf32, #tpu.memory_space<vmem>>, vector<8x128xf32>
    %c0_9 = arith.constant 0 : index
    %c0_10 = arith.constant 0 : index
    %6 = vector.load %arg9[%c0_9, %c0_10] : memref<8x384xf32, #tpu.memory_space<vmem>>, vector<8x128xf32>
    %c0_11 = arith.constant 0 : index
    %c128_12 = arith.constant 128 : index
    %7 = vector.load %arg9[%c0_11, %c128_12] : memref<8x384xf32, #tpu.memory_space<vmem>>, vector<8x128xf32>
    %c0_13 = arith.constant 0 : index
    %c256_14 = arith.constant 256 : index
    %8 = vector.load %arg9[%c0_13, %c256_14] : memref<8x384xf32, #tpu.memory_space<vmem>>, vector<8x128xf32>
    %c0_15 = arith.constant 0 : index
    %c0_16 = arith.constant 0 : index
    %9 = vector.load %arg10[%c0_15, %c0_16] : memref<8x384xf32, #tpu.memory_space<vmem>>, vector<8x128xf32>
    %c0_17 = arith.constant 0 : index
    %c128_18 = arith.constant 128 : index
    %10 = vector.load %arg10[%c0_17, %c128_18] : memref<8x384xf32, #tpu.memory_space<vmem>>, vector<8x128xf32>
    %c0_19 = arith.constant 0 : index
    %c256_20 = arith.constant 256 : index
    %11 = vector.load %arg10[%c0_19, %c256_20] : memref<8x384xf32, #tpu.memory_space<vmem>>, vector<8x128xf32>
    %12 = arith.mulf %9, %6 : vector<8x128xf32>
    %13 = arith.mulf %10, %7 : vector<8x128xf32>
    %14 = arith.addf %12, %13 : vector<8x128xf32>
    %15 = arith.mulf %3, %14 : vector<8x128xf32>
    %16 = arith.mulf %9, %7 : vector<8x128xf32>
    %17 = arith.mulf %10, %6 : vector<8x128xf32>
    %18 = arith.subf %16, %17 : vector<8x128xf32>
    %19 = arith.mulf %4, %18 : vector<8x128xf32>
    %20 = arith.addf %15, %19 : vector<8x128xf32>
    %21 = arith.mulf %5, %8 : vector<8x128xf32>
    %22 = arith.mulf %21, %11 : vector<8x128xf32>
    %23 = arith.addf %20, %22 : vector<8x128xf32>
    %cst = arith.constant dense<0.000000e+00> : vector<8xf32>
    %24 = vector.multi_reduction <add>, %23, %cst [1] : vector<8x128xf32> to vector<8xf32>
    %25 = vector.shape_cast %24 : vector<8xf32> to vector<8x1xf32>
    %c0_21 = arith.constant 0 : index
    %c0_22 = arith.constant 0 : index
    %26 = vector.load %arg6[%c0_21, %c0_22] : memref<8x1xf32, #tpu.memory_space<vmem>>, vector<8x1xf32>
    %27 = arith.mulf %25, %26 : vector<8x1xf32>
    %cst_23 = arith.constant 0.000000e+00 : f32
    %28 = vector.broadcast %cst_23 : f32 to vector<8x1xf32>
    %29 = arith.subf %28, %27 : vector<8x1xf32>
    %cst_24 = arith.constant 0.000000e+00 : f32
    %30 = vector.broadcast %cst_24 : f32 to vector<8x1xf32>
    %31 = arith.maximumf %29, %30 : vector<8x1xf32>
    %32 = math.absf %27 : vector<8x1xf32>
    %cst_25 = arith.constant 0.000000e+00 : f32
    %33 = vector.broadcast %cst_25 : f32 to vector<8x1xf32>
    %34 = arith.subf %33, %32 : vector<8x1xf32>
    %35 = math.exp %34 : vector<8x1xf32>
    %cst_26 = arith.constant 1.000000e+00 : f32
    %36 = vector.broadcast %cst_26 : f32 to vector<8x1xf32>
    %37 = arith.addf %36, %35 : vector<8x1xf32>
    %38 = math.log %37 : vector<8x1xf32>
    %39 = arith.addf %31, %38 : vector<8x1xf32>
    %40 = tpu.iota {dimensions = array<i32: 0>} : vector<8x1xi32>
    %41 = vector.broadcast %0 : i32 to vector<8x1xi32>
    %42 = arith.addi %41, %40 : vector<8x1xi32>
    %c8_i32_27 = arith.constant 8 : i32
    %43 = vector.broadcast %c8_i32_27 : i32 to vector<8x1xi32>
    %44 = arith.cmpi slt, %42, %43 : vector<8x1xi32>
    %45 = arith.extui %44 : vector<8x1xi1> to vector<8x1xi32>
    %46 = arith.sitofp %45 : vector<8x1xi32> to vector<8x1xf32>
    %47 = arith.mulf %39, %46 : vector<8x1xf32>
    %cst_28 = arith.constant dense<0.000000e+00> : vector<1xf32>
    %48 = vector.multi_reduction <add>, %47, %cst_28 [0] : vector<8x1xf32> to vector<1xf32>
    %49 = vector.shape_cast %48 : vector<1xf32> to vector<1x1xf32>
    %50 = vector.shape_cast %49 : vector<1x1xf32> to vector<1x1x1xf32>
    %c0_29 = arith.constant 0 : index
    %c0_30 = arith.constant 0 : index
    %c0_31 = arith.constant 0 : index
    %51 = vector.load %arg7[%c0_29, %c0_30, %c0_31] : memref<1x1x1xf32, #tpu.memory_space<vmem>>, vector<1x1x1xf32>
    tpu.vector_store %arg7[%c0_29, %c0_30, %c0_31], %50 {strides = array<i32>} : memref<1x1x1xf32, #tpu.memory_space<vmem>>, vector<1x1x1xf32>,
    return
  }
  func.func @transform_2(%arg0: i32, %arg1: memref<16xi32, #tpu.memory_space<smem>>, %arg2: memref<16xi32, #tpu.memory_space<smem>>, %arg3: memref<16xi32, #tpu.memory_space<smem>>) -> (i32, i32) {
    %c0_i32 = arith.constant 0 : i32
    %c0_i32_0 = arith.constant 0 : i32
    return %arg0, %c0_i32 : i32, i32
  }
  func.func @transform_3(%arg0: i32, %arg1: memref<16xi32, #tpu.memory_space<smem>>, %arg2: memref<16xi32, #tpu.memory_space<smem>>, %arg3: memref<16xi32, #tpu.memory_space<smem>>) -> (i32, i32, i32) {
    %c0_i32 = arith.constant 0 : i32
    %c0_i32_0 = arith.constant 0 : i32
    %c0_i32_1 = arith.constant 0 : i32
    return %arg0, %c0_i32, %c0_i32_0 : i32, i32, i32
  }
}

</mosaic_0001>

<bundles_post_ra>
// kernel: analogy_forward_pallas.1
= control target key start
LH: loop header
LB: loop body
LE: loop exit
PB: predicated region body
PF: predicated region fallthrough
CT: control target
= control target key end

     0   :  { %s687_s0 = inlined_call_operand.vmem [shape: s32[16], index: 0, kind: input, shape index: {}]   ;;  %s688_s3 = inlined_call_operand.hbm [shape: f32[64,384], index: 3, kind: input, shape index: {}]   ;;  %s689_s4 = inlined_call_operand.hbm [shape: f32[16,384], index: 4, kind: input, shape index: {}]   ;;  %s690_s5 = inlined_call_operand.vmem [shape: f32[16,1], index: 5, kind: input, shape index: {}]   ;;  %s691_s6 = inlined_call_operand.vmem [shape: f32[2,1,1], index: 6, kind: output, shape index: {}]   ;;  %s692_s1 = inlined_call_operand.vmem [shape: s32[16], index: 1, kind: input, shape index: {}]   ;;  %s693_s2 = inlined_call_operand.vmem [shape: s32[16], index: 2, kind: input, shape index: {}]  }
   0x1   :  { %s11_s23 = sshll.u32 %s687_s0, 4  ;;  %s15_s26 = sshll.u32 %s692_s1, 4  ;;  %s12_s23 = int_to_ptr.vmem [resolvable:$true] %s11_s23  ;;  %s16_s26 = int_to_ptr.vmem [resolvable:$true] %s15_s26 }
   0x2   :  { %s397_s27 = scalar_lea.vmem %s12_s23, 16  ;;  %p402_p1 = scmp.lt.s32.totalorder %s12_s23, %s12_s23 }
   0x3   :  { %p398_p0 = scmp.ne.s32.totalorder %s12_s23, %s397_s27  ;;  %p403_p2 = scmp.lt.s32.totalorder %s397_s27, %s397_s27 }
   0x5   :  { %p404_p3 = por %p403_p2, %p402_p1 }
   0x7   :  { %p405_p4 = pnand %p404_p3, %p398_p0 }
   0x9   :  { %408 = shalt.err (!%p405_p4)  }
   0xa   :  { %s531_s28 = smov [#allocation7]   ;;  %s409_s29 = scalar_lea.vmem %s16_s26, 16 }
   0xb   :  { %14 = dma.vmem_to_smem %s12_s23, 16, %s531_s28, [#allocation6] }
   0xc   :  { %p410_p5 = scmp.ne.s32.totalorder %s16_s26, %s409_s29  ;;  %p414_p6 = scmp.lt.s32.totalorder %s16_s26, %s16_s26 }
   0xd   :  { %p415_p7 = scmp.lt.s32.totalorder %s409_s29, %s409_s29 }
   0xf   :  { %p416_p8 = por %p415_p7, %p414_p6 }
  0x11   :  { %p417_p9 = pnand %p416_p8, %p410_p5 }
  0x13   :  { %420 = shalt.err (!%p417_p9)  }
  0x14   :  { %s532_s0 = smov [#allocation8]   ;;  %s19_s7 = sshll.u32 %s693_s2, 4  ;;  %s20_s7 = int_to_ptr.vmem [resolvable:$true] %s19_s7 }
  0x15   :  { %18 = dma.vmem_to_smem %s16_s26, 16, %s532_s0, [#allocation6] }
  0x16   :  { %s421_s8 = scalar_lea.vmem %s20_s7, 16  ;;  %p426_p11 = scmp.lt.s32.totalorder %s20_s7, %s20_s7 }
  0x17   :  { %p422_p10 = scmp.ne.s32.totalorder %s20_s7, %s421_s8  ;;  %p427_p12 = scmp.lt.s32.totalorder %s421_s8, %s421_s8 }
  0x19   :  { %p428_p13 = por %p427_p12, %p426_p11 }
  0x1b   :  { %p429_p0 = pnand %p428_p13, %p422_p10 }
  0x1d   :  { %432 = shalt.err (!%p429_p0)  }
  0x1e   :  { %s533_s9 = smov [#allocation9]  }
  0x1f   :  { %22 = dma.vmem_to_smem %s20_s7, 16, %s533_s9, [#allocation6] }
  0x20   :  { %511 = dma.done.wait [#allocation6], 48 }
  0x21   :  { %512 = vsyncadd [#allocation6], 4294967248 }
  0x22   :  { %24 = sfence }
  0x23   :  { %s584_s10 = smov 0  }
  0x24 LB: > { %s590_s2 = sadd.s32 4294967295, %s521_s10   ;;  %p351_p1 = scmp.ge.s32.totalorder %s521_s10, 1  ;;  %s521_s10 = sphi %s584_s10, %s30_s10  }
  0x25   : > { %p105_p2 = scmp.lt.s32.totalorder %s521_s10, 3 }
  0x27   : > { %p106_p3 = pnand %p351_p1, %p105_p2 }
  0x28   : > { %p122_p4 = scmp.lt.s32.totalorder (!%p106_p3), %s590_s2, 1  ;;  %s609_s20 = smov (!%p106_p3), 0  }
  0x29   : > { %109 = sbr.rel (%p106_p3) target bundleno = 353 (0x161), region = 24 }
  0x2e   : > { %s597_s12 = scalar_select %p122_p4, %s590_s2, 1 }
  0x30   : > { %s352_s13 = sshll.u32 %s597_s12, 3 }
  0x31   : > { %s607_s19 = scalar_lea.vmem %s690_s5, %s352_s13 }
  0x32 LB: >> { %s694_s11 = sshll.u32 %s590_s2, 3  ;;  %s144_s22 = sshrl.u32 %s525_s20, 3  ;;  %s525_s20 = sphi %s609_s20, %s135_s20  }
  0x33   : >> { %s136_s21 = sadd.s32 %s525_s20, %s694_s11  ;;  %s145_s24 = sand.u32 7, %s525_s20  }
  0x34   : >> { %s137_s23 = sld [smem:[#allocation7 + %s136_s21]]  ;;  %s146_s25 = smul.u32 24, %s144_s22 }
  0x35   : >> { %s154_s26 = sld [smem:[#allocation9 + %s136_s21]] }
  0x36   : >> { %s619_s27 = sadd.s32 %s146_s25, %s145_s24  ;;  %s621_s28 = sld [smem:[#allocation8 + %s136_s21]] }
  0x37   : >> { %s148_s29 = scalar_lea.vmem [#allocation2], %s619_s27  ;;  %s161_s1 = scalar_lea.vmem [#allocation3], %s619_s27 }
  0x38   : >> { %s150_s0 = sshll.u32 %s148_s29, 4  ;;  %s164_s30 = sshll.u32 %s161_s1, 4  ;;  %s625_s0 = int_to_ptr.vmem [resolvable:$true] %s150_s0  ;;  %s627_s30 = int_to_ptr.vmem [resolvable:$true] %s164_s30 }
  0x3a   : >> { %s138_s7 = sshrl.u32 %s137_s23, 3  ;;  %s139_s8 = sand.u32 7, %s137_s23  }
  0x3b   : >> { %s140_s9 = smul.u32 24, %s138_s7  ;;  %s155_s13 = sshrl.u32 %s154_s26, 3 }
  0x3c   : >> { %s156_s14 = sand.u32 7, %s154_s26   ;;  %s157_s17 = smul.u32 24, %s155_s13 }
  0x3d   : >> { %s141_s15 = sadd.s32 %s140_s9, %s139_s8  ;;  %s435_s23 = scalar_lea.hbm %s688_s3, 3072 }
  0x3e   : >> { %s354_s18 = sshll.u32 %s141_s15, 4  ;;  %s158_s25 = sadd.s32 %s157_s17, %s156_s14 }
  0x3f   : >> { %s143_s21 = scalar_lea.hbm %s688_s3, %s354_s18 }
  0x40   : >> { %s433_s29 = scalar_lea.hbm %s143_s21, 48  ;;  %p436_p6 = scmp.lt.s32.totalorder %s143_s21, %s688_s3 }
  0x41   : >> { %p434_p5 = scmp.ne.s32.totalorder %s143_s21, %s433_s29  ;;  %p437_p7 = scmp.lt.s32.totalorder %s435_s23, %s433_s29 }
  0x43   : >> { %p438_p8 = por %p437_p7, %p436_p6 }
  0x45   : >> { %p439_p9 = pnand %p438_p8, %p434_p5 }
  0x47   : >> { %442 = shalt.err (!%p439_p9)  }
  0x48   : >> { %s443_s26 = scalar_lea.vmem %s625_s0, 48  ;;  %s534_s8 = smov [#allocation2]  }
  0x49   : >> { %p444_p10 = scmp.ne.s32.totalorder %s625_s0, %s443_s26  ;;  %s445_s9 = sshll.u32 %s534_s8, 4  ;;  %s446_s9 = int_to_ptr.vmem [resolvable:$false] %s445_s9 }
  0x4a   : >> { %s447_s13 = scalar_lea.vmem %s446_s9, 384  ;;  %p448_p11 = scmp.lt.s32.totalorder %s625_s0, %s446_s9 }
  0x4b   : >> { %p449_p12 = scmp.lt.s32.totalorder %s447_s13, %s443_s26 }
  0x4d   : >> { %p450_p13 = por %p449_p12, %p448_p11 }
  0x4f   : >> { %p451_p0 = pnand %p450_p13, %p444_p10 }
  0x51   : >> { %454 = shalt.err (!%p451_p0)  }
  0x52   : >> { %s535_s11 = smov 128   ;;  %s536_s16 = smov 1  }
  0x53   : >> { %153 = dma.hbm_to_vmem [thread:$0]  %s143_s21, 48, %s625_s0, [#allocation5], %s535_s11, %s535_s11, %s536_s16 }
  0x54   : >> { %s355_s14 = sshll.u32 %s158_s25, 4  ;;  %s169_s15 = sshrl.u32 %s621_s28, 3 }
  0x55   : >> { %s160_s22 = scalar_lea.hbm %s688_s3, %s355_s14  ;;  %s170_s24 = sand.u32 7, %s621_s28  }
  0x56   : >> { %s455_s29 = scalar_lea.hbm %s160_s22, 48  ;;  %p458_p2 = scmp.lt.s32.totalorder %s160_s22, %s688_s3 }
  0x57   : >> { %p456_p1 = scmp.ne.s32.totalorder %s160_s22, %s455_s29  ;;  %p459_p3 = scmp.lt.s32.totalorder %s435_s23, %s455_s29 }
  0x59   : >> { %p460_p4 = por %p459_p3, %p458_p2 }
  0x5b   : >> { %p461_p5 = pnand %p460_p4, %p456_p1 }
  0x5d   : >> { %464 = shalt.err (!%p461_p5)  }
  0x5e   : >> { %s465_s0 = scalar_lea.vmem %s627_s30, 48  ;;  %s537_s21 = smov [#allocation3]  }
  0x5f   : >> { %p466_p6 = scmp.ne.s32.totalorder %s627_s30, %s465_s0  ;;  %s467_s25 = sshll.u32 %s537_s21, 4  ;;  %s468_s25 = int_to_ptr.vmem [resolvable:$false] %s467_s25 }
  0x60   : >> { %s469_s26 = scalar_lea.vmem %s468_s25, 384  ;;  %p470_p7 = scmp.lt.s32.totalorder %s627_s30, %s468_s25 }
  0x61   : >> { %p471_p8 = scmp.lt.s32.totalorder %s469_s26, %s465_s0 }
  0x63   : >> { %p472_p9 = por %p471_p8, %p470_p7 }
  0x65   : >> { %p473_p10 = pnand %p472_p9, %p466_p6 }
  0x67   : >> { %476 = shalt.err (!%p473_p10)  }
  0x68   : >> { %167 = dma.hbm_to_vmem [thread:$0]  %s160_s22, 48, %s627_s30, [#allocation5 + $0x1], %s535_s11, %s535_s11, %s536_s16 }
  0x69   : >> { %s171_s28 = smul.u32 24, %s169_s15  ;;  %s175_s23 = scalar_lea.vmem [#allocation4], %s619_s27 }
  0x6a   : >> { %s178_s8 = sshll.u32 %s175_s23, 4  ;;  %s479_s0 = scalar_lea.hbm %s689_s4, 768  ;;  %s179_s8 = int_to_ptr.vmem [resolvable:$true] %s178_s8 }
  0x6b   : >> { %s172_s9 = sadd.s32 %s171_s28, %s170_s24 }
  0x6c   : >> { %s356_s13 = sshll.u32 %s172_s9, 4 }
  0x6d   : >> { %s174_s18 = scalar_lea.hbm %s689_s4, %s356_s13 }
  0x6e   : >> { %s477_s29 = scalar_lea.hbm %s174_s18, 48  ;;  %p480_p12 = scmp.lt.s32.totalorder %s174_s18, %s689_s4 }
  0x6f   : >> { %p478_p11 = scmp.ne.s32.totalorder %s174_s18, %s477_s29  ;;  %p481_p13 = scmp.lt.s32.totalorder %s479_s0, %s477_s29 }
  0x71   : >> { %p482_p0 = por %p481_p13, %p480_p12 }
  0x73   : >> { %p483_p1 = pnand %p482_p0, %p478_p11 }
  0x75   : >> { %486 = shalt.err (!%p483_p1)  }
  0x76   : >> { %s487_s27 = scalar_lea.vmem %s179_s8, 48  ;;  %s538_s30 = smov [#allocation4]  }
  0x77   : >> { %p488_p2 = scmp.ne.s32.totalorder %s179_s8, %s487_s27  ;;  %s489_s15 = sshll.u32 %s538_s30, 4  ;;  %s490_s15 = int_to_ptr.vmem [resolvable:$false] %s489_s15 }
  0x78   : >> { %s491_s22 = scalar_lea.vmem %s490_s15, 384  ;;  %p492_p3 = scmp.lt.s32.totalorder %s179_s8, %s490_s15 }
  0x79   : >> { %p493_p4 = scmp.lt.s32.totalorder %s491_s22, %s487_s27 }
  0x7b   : >> { %p494_p5 = por %p493_p4, %p492_p3 }
  0x7d   : >> { %p495_p6 = pnand %p494_p5, %p488_p2 }
  0x7f   : >> { %498 = shalt.err (!%p495_p6)  }
  0x80   : >> { %181 = dma.hbm_to_vmem [thread:$0]  %s174_s18, 48, %s179_s8, [#allocation5 + $0x2], %s535_s11, %s535_s11, %s536_s16 }
  0x81   : >> { %s135_s20 = sadd.s32 1, %s525_s20  }
  0x82   : >> { %p132_p7 = scmp.ge.s32.totalorder %s135_s20, 8  }
  0x83   : > { %s527_s24 = smov (%p132_p7), 0  }
  0x84   : > { %134 = sbr.rel (!%p132_p7) target bundleno = 50 (0x32), region = 80 }
  0x89 LB: >> { %513 = dma.done.wait [#allocation5], 48  ;;  %s529_s24 = sphi %s527_s24, %s187_s24  }
  0x8a   : >> { %514 = vsyncadd [#allocation5], 4294967248 }
  0x8b   : >> { %515 = dma.done.wait [#allocation5 + $0x1], 48 }
  0x8c   : >> { %516 = vsyncadd [#allocation5 + $0x1], 4294967248 }
  0x8d   : >> { %517 = dma.done.wait [#allocation5 + $0x2], 48 }
  0x8e   : >> { %518 = vsyncadd [#allocation5 + $0x2], 4294967248  ;;  %s187_s24 = sadd.s32 1, %s529_s24  }
  0x8f   : >> { %p184_p8 = scmp.ge.s32.totalorder %s187_s24, 8  }
  0x90   : > { %v198_v0 = vld [vmem:[#allocation2 + $0x10] sm:$0xff] (%p184_p8)  ;;  %v199_v1 = vld [vmem:[#allocation3] sm:$0xff] (%p184_p8)  ;;  %v200_v2 = vld [vmem:[#allocation3 + $0x8] sm:$0xff] (%p184_p8)  ;;  %v231_v29 = vlaneseq (%p184_p8)  ;;  %s695_s20 = sshll.u32 (%p184_p8), %s590_s2, 3  ;;  %v539_v37 = vmov (%p184_p8), 0.0   ;;  %vm239_vm1 = vcmask (%p184_p8), 7168   ;;  %s696_s11 = scalar_lea.vmem (%p184_p8), %s691_s6, %s597_s12 }
  0x91   : > { %186 = sbr.rel (!%p184_p8) target bundleno = 137 (0x89), region = 91  ;;  %v201_v3 = vld [vmem:[#allocation3 + $0x10] sm:$0xff] (%p184_p8)  ;;  %v202_v4 = vld [vmem:[#allocation4] sm:$0xff] (%p184_p8)  ;;  %v203_v5 = vld [vmem:[#allocation4 + $0x8] sm:$0xff] (%p184_p8)  ;;  %v233_v31 = vstv (%p184_p8), %s695_s20  ;;  %vm247_vm2 = vcmask (%p184_p8), 0  }
  0x92   : > { %v214_v6 = vmul.f32 (%p184_p8), %v201_v3, %v198_v0  ;;  %v205_v7 = vmul.f32 (%p184_p8), %v202_v4, %v199_v1  ;;  %v206_v8 = vmul.f32 (%p184_p8), %v203_v5, %v200_v2  ;;  %v209_v9 = vmul.f32 (%p184_p8), %v202_v4, %v200_v2  ;;  %v196_v11 = vld [vmem:[#allocation2] sm:$0xff] (%p184_p8)  ;;  %v197_v12 = vld [vmem:[#allocation2 + $0x8] sm:$0xff] (%p184_p8) }
  0x93   : > { %v210_v10 = vmul.f32 (%p184_p8), %v203_v5, %v199_v1  ;;  %v204_v13 = vld [vmem:[#allocation4 + $0x10] sm:$0xff] (%p184_p8)  ;;  %v232_v30 = vshrl.u32 (%p184_p8), %v231_v29, 7 }
  0x94   : > { %v207_v14 = vadd.f32 (%p184_p8), %v206_v8, %v205_v7  ;;  %v215_v18 = vmul.f32 (%p184_p8), %v214_v6, %v204_v13  ;;  %v219_v21 = vld [vmem:[%s607_s19] sm:$0xff] (%p184_p8) }
  0x95   : > { %v211_v15 = vsub.f32 (%p184_p8), %v209_v9, %v210_v10  ;;  %v234_v32 = vadd.s32 (%p184_p8), %v233_v31, %v232_v30 }
  0x96   : > { %v208_v16 = vmul.f32 %v207_v14, %v196_v11 }
  0x97   : > { %v212_v17 = vmul.f32 %v211_v15, %v197_v12  ;;  %vm235_vm0 = vcmp.lt.s32.totalorder %v234_v32, 8 }
  0x98   : > { %v357_v38 = vsel %vm235_vm0, 1.0, %v539_v37 }
  0x99   : > { %v213_v19 = vadd.f32 %v212_v17, %v208_v16 }
  0x9b   : > { %v216_v20 = vadd.f32 %v215_v18, %v213_v19 }
  0x9d   : > { %217 = vadd.xlane.f32.xlu0 %v216_v20 }
 0x126   : > { %v218_v22 = vpop.xlane.xlu0 %217 }
 0x127   : > { %v220_v23 = vmul.f32 %v219_v21, %v218_v22 }
 0x129   : > { %v223_v24 = vand.u32 2147483647, %v220_v23  ;;  %v221_v33 = vsub.f32 0.0, %v220_v23 }
 0x12b   : > { %v224_v25 = vsub.f32 0.0, %v223_v24  ;;  %v222_v35 = vmax.f32 %v221_v33, 0.0 }
 0x12d   : > { %v225_v26 = vmul.f32 1.442695, %v224_v25 }
 0x12f   : > { %393 = vpow2.f32 %v225_v26 }
 0x13c   : > { %v394_v27 = vpop.eup %393 }
 0x13d   : > { %v227_v28 = vadd.f32 1.0, %v394_v27 }
 0x13f   : > { %395 = vlog2.f32 %v227_v28 }
 0x14c   : > { %v396_v34 = vpop.eup %395 }
 0x14d   : > { %v229_v36 = vmul.f32 0.6931472, %v396_v34 }
 0x14f   : > { %v230_v39 = vadd.f32 %v229_v36, %v222_v35 }
 0x151   : > { %v238_v40 = vmul.f32 %v357_v38, %v230_v39 }
 0x153   : > { %v240_v41 = vsel %vm239_vm1, %v238_v40, 0.0 }
 0x154   : > { %v241_v42 = vrot.slane %v240_v41, 4 }
 0x156   : > { %v242_v43 = vadd.f32 %v241_v42, %v240_v41 }
 0x158   : > { %v243_v44 = vrot.slane %v242_v43, 2 }
 0x15a   : > { %v244_v45 = vadd.f32 %v243_v44, %v242_v43 }
 0x15c   : > { %v245_v46 = vrot.slane %v244_v45, 1 }
 0x15e   : > { %v246_v47 = vadd.f32 %v245_v46, %v244_v45 }
 0x160   : > { %248 = vst.msk [vmem:[%s696_s11] sm:$0x1] %vm247_vm2, %v246_v47 }
 0x161 PF: > { %s30_s10 = sadd.s32 1, %s521_s10  }
 0x162   : > { %p27_p9 = scmp.ge.s32.totalorder %s30_s10, 4  }
 0x164   :  { %29 = sbr.rel (!%p27_p9) target bundleno = 36 (0x24), region = 102 }
 0x169   :  { %266 = vsyncmov [#allocation5] }
 0x16c   :  { %s267_s16 = vpop.sfrf %266 }
 0x16d   :  { %p360_p10 = scmp.ne.s32.totalorder %s267_s16, 0 }
 0x16f   :  { %271 = shalt.err (%p360_p10)  }
 0x170   :  { %273 = vsyncmov [#allocation5 + $0x1] }
 0x173   :  { %s274_s26 = vpop.sfrf %273 }
 0x174   :  { %p361_p11 = scmp.ne.s32.totalorder %s274_s26, 0 }
 0x176   :  { %278 = shalt.err (%p361_p11)  }
 0x177   :  { %280 = vsyncmov [#allocation5 + $0x2] }
 0x17a   :  { %s281_s28 = vpop.sfrf %280 }
 0x17b   :  { %p362_p12 = scmp.ne.s32.totalorder %s281_s28, 0 }
 0x17d   :  { %285 = shalt.err (%p362_p12)  }

</bundles_post_ra>
